<compile_context>
chip_gen: v5e
topology: v5e:2x2
jax: 0.10.0
libtpu: 0.0.40
codegen_flags: <defaults>
</compile_context>

<pallas_src>
import functools

import jax
import jax.numpy as jnp
from jax.experimental import pallas as pl
from jax.experimental.pallas import tpu as pltpu


# ----------------------------- Pallas kernels ------------------------------

def _mm_epilogue_kernel(*refs, relu, has_residual):
    """Single-K-block fused stage: (TM,K)@(K,Cout) + bias (+res) (+ReLU).

    The whole folded weight is resident, so each M tile is one MXU matmul
    (bf16 operands, f32 result) with the epilogue fused in f32. No scratch.
    """
    if has_residual:
        p_ref, w_ref, b_ref, r_ref, o_ref = refs
    else:
        p_ref, w_ref, b_ref, o_ref = refs
        r_ref = None
    out = jnp.dot(p_ref[...], w_ref[...], preferred_element_type=jnp.float32)
    out = out + b_ref[...]                       # f32 epilogue (v5e: no bf16 VALU)
    if r_ref is not None:
        out = out + r_ref[...].astype(jnp.float32)
    if relu:
        out = jnp.maximum(out, 0.0)
    o_ref[...] = out.astype(o_ref.dtype)


def _mm_kacc_kernel(*refs, relu, has_residual):
    """Fallback for K too large to hold resident: accumulate over a K grid
    axis in an f32 VMEM scratch, fused epilogue at the last K step.
    (Not reached for ResNet-18 BasicBlock layer shapes.)"""
    if has_residual:
        p_ref, w_ref, b_ref, r_ref, o_ref, acc_ref = refs
    else:
        p_ref, w_ref, b_ref, o_ref, acc_ref = refs
        r_ref = None

    @pl.when(pl.program_id(1) == 0)
    def _():
        acc_ref[...] = jnp.zeros_like(acc_ref)

    acc_ref[...] += jnp.dot(p_ref[...], w_ref[...],
                            preferred_element_type=jnp.float32)

    @pl.when(pl.program_id(1) == pl.num_programs(1) - 1)
    def _():
        out = acc_ref[...] + b_ref[...]
        if r_ref is not None:
            out = out + r_ref[...].astype(jnp.float32)
        if relu:
            out = jnp.maximum(out, 0.0)
        o_ref[...] = out.astype(o_ref.dtype)


# ----------------------------- tiling helpers -------------------------------

def _round_up(x, m):
    return ((x + m - 1) // m) * m


def _pad2d(a, rows, cols):
    r, c = a.shape
    if r == rows and c == cols:
        return a
    return jnp.pad(a, ((0, rows - r), (0, cols - c)))


def _vmem_capacity_bytes():
    try:
        return int(pltpu.get_tpu_info().vmem_capacity_bytes)
    except Exception:                       # conservative fallback
        return 64 * 1024 * 1024             # v7x per-TensorCore VMEM


def _choose_m_tile(M, vmem_cap):
    """(TM, M_pad): >= 2 parallel M tiles when possible (v7x has 2 TCs),
    256-aligned tiles for the 256x256 MXUs, generation-aware upper bound."""
    M8 = _round_up(M, 8)                    # sublane granularity
    if M8 <= 64:
        return M8, M8                       # too small to split usefully
    if M8 <= 512:
        TM = _round_up((M8 + 1) // 2, 8)    # two tiles -> both v7x cores busy
        return TM, 2 * TM
    if vmem_cap >= 96 * 1024 * 1024:        # v5e / v6e (128 MiB VMEM)
        TM = 1024 if M8 >= 2048 else 512
    else:                                   # v7x (64 MiB VMEM)
        TM = 512 if M8 >= 1024 else 256
    return TM, _round_up(M8, TM)


_WEIGHT_RESIDENT_BYTES = 8 * 1024 * 1024    # hold the full weight when <= 8 MiB


def _choose_k_tile(K_pad, Cout_p):
    """Whole K in one block whenever the bf16 weight is small enough
    (ResNet-18 worst case 4608x512 bf16 = 4.5 MiB); otherwise split."""
    if K_pad * Cout_p * 2 <= _WEIGHT_RESIDENT_BYTES:
        return K_pad, 1
    TK = 128
    for t in range(256, 1025, 128):         # largest 128-multiple divisor <= 1024
        if K_pad % t == 0:
            TK = t
    return TK, K_pad // TK


# ----------------------------- fused conv stage ------------------------------

def _fused_conv_bn(patches, w_pad, b_row, *, relu, residual=None,
                   out_dtype=jnp.float32):
    """One conv+BN(+residual)(+ReLU) stage as a Pallas matmul.

    patches: (M, K) im2col matrix; w_pad: (K_pad, Cout_p) bf16 with BN scale
    folded in; b_row: (1, Cout) f32 folded bias; residual: (M, Cout) or None.
    Returns the (M, Cout) result in out_dtype.
    """
    M, K = patches.shape
    K_pad, Cout_p = w_pad.shape
    Cout = b_row.shape[1]
    assert K_pad == _round_up(K, 128) and Cout_p == _round_up(Cout, 128)

    vmem_cap = _vmem_capacity_bytes()
    TM, M_pad = _choose_m_tile(M, vmem_cap)
    TK, k_tiles = _choose_k_tile(K_pad, Cout_p)
    out_bytes = jnp.dtype(out_dtype).itemsize

    # bf16 MXU operands, lane-dense zero padding.
    p = _pad2d(patches.astype(jnp.bfloat16), M_pad, K_pad)
    b = _pad2d(b_row.astype(jnp.float32), 1, Cout_p)
    r = None
    if residual is not None:
        r = _pad2d(residual.astype(jnp.bfloat16), M_pad, Cout_p)

    if k_tiles == 1:
        # Common path: weight fully resident, no K axis, no accumulator.
        grid = (M_pad // TM,)
        in_specs = [
            pl.BlockSpec((TM, K_pad), lambda i: (i, 0)),
            pl.BlockSpec((K_pad, Cout_p), lambda i: (0, 0),
                         pipeline_mode=pl.Buffered(1)),      # block-constant
            pl.BlockSpec((1, Cout_p), lambda i: (0, 0),
                         pipeline_mode=pl.Buffered(1)),       # block-constant
        ]
        args = [p, w_pad, b]
        if r is not None:
            in_specs.append(pl.BlockSpec((TM, Cout_p), lambda i: (i, 0)))
            args.append(r)
        out_spec = pl.BlockSpec((TM, Cout_p), lambda i: (i, 0))
        kernel = functools.partial(_mm_epilogue_kernel, relu=relu,
                                   has_residual=r is not None)
        scratch = []
        semantics = ("parallel",)
        w_bufs, r_bufs, acc_bytes, weight_reads = 1, 2, 0, 1
    else:
        # Fallback: K-reduction grid axis with f32 accumulator scratch.
        grid = (M_pad // TM, k_tiles)
        in_specs = [
            pl.BlockSpec((TM, TK), lambda i, k: (i, k)),
            pl.BlockSpec((TK, Cout_p), lambda i, k: (k, 0)),
            pl.BlockSpec((1, Cout_p), lambda i, k: (0, 0),
                         pipeline_mode=pl.Buffered(1)),
        ]
        args = [p, w_pad, b]
        if r is not None:
            in_specs.append(pl.BlockSpec((TM, Cout_p), lambda i, k: (i, 0),
                                         pipeline_mode=pl.Buffered(1)))
            args.append(r)
        out_spec = pl.BlockSpec((TM, Cout_p), lambda i, k: (i, 0))
        kernel = functools.partial(_mm_kacc_kernel, relu=relu,
                                   has_residual=r is not None)
        scratch = [pltpu.VMEM((TM, Cout_p), jnp.float32)]
        semantics = ("parallel", "arbitrary")
        w_bufs, r_bufs, acc_bytes, weight_reads = 2, 1, TM * Cout_p * 4, M_pad // TM

    # Tight VMEM model of the buffers actually allocated, + headroom, capped
    # at 75% of this generation's physical VMEM (valid on v7x's 64 MiB).
    tile_bytes = (2 * TM * TK * 2                      # patches, double-buffered
                  + w_bufs * TK * Cout_p * 2           # weight
                  + Cout_p * 4                         # bias (single buffer)
                  + 2 * TM * Cout_p * out_bytes        # output, double-buffered
                  + (r_bufs * TM * Cout_p * 2 if r is not None else 0)
                  + acc_bytes)
    vmem_limit = int(min(vmem_cap * 3 // 4, tile_bytes + (8 << 20)))

    flops = 2 * M_pad * K_pad * Cout_p
    bytes_accessed = int(M_pad * K_pad * 2
                         + K_pad * Cout_p * 2 * weight_reads
                         + M_pad * Cout_p * out_bytes
                         + (M_pad * Cout_p * 2 if r is not None else 0))

    out = pl.pallas_call(
        kernel,
        out_shape=jax.ShapeDtypeStruct((M_pad, Cout_p), out_dtype),
        grid_spec=pltpu.PrefetchScalarGridSpec(
            num_scalar_prefetch=0,
            grid=grid,
            in_specs=in_specs,
            out_specs=out_spec,
            scratch_shapes=scratch,
        ),
        compiler_params=pltpu.CompilerParams(
            dimension_semantics=semantics,
            vmem_limit_bytes=vmem_limit,
        ),
        cost_estimate=pl.CostEstimate(
            flops=flops, transcendentals=0, bytes_accessed=bytes_accessed),
    )(*args)
    return out[:M, :Cout]


# ------------------------------ JAX glue ------------------------------------

def _im2col(x_nhwc, ksize, stride, padding):
    """NHWC -> (N*Ho*Wo, ksize*ksize*C); row order (n, ho, wo), tap (ky, kx, c)."""
    N, H, W, C = x_nhwc.shape
    xp = jnp.pad(x_nhwc,
                 ((0, 0), (padding, padding), (padding, padding), (0, 0)))
    Ho = (H + 2 * padding - ksize) // stride + 1
    Wo = (W + 2 * padding - ksize) // stride + 1
    taps = []
    for ky in range(ksize):
        for kx in range(ksize):
            taps.append(xp[:, ky:ky + (Ho - 1) * stride + 1:stride,
                           kx:kx + (Wo - 1) * stride + 1:stride, :])
    p = jnp.concatenate(taps, axis=-1)          # (N, Ho, Wo, k*k*C)
    return p.reshape(N * Ho * Wo, ksize * ksize * C), (N, Ho, Wo)


def _w_to_mat(w_oihw):
    """PyTorch conv weight (Cout, Cin, kH, kW) -> (kH*kW*Cin, Cout)."""
    Cout, Cin, kH, kW = w_oihw.shape
    return jnp.transpose(w_oihw, (2, 3, 1, 0)).reshape(kH * kW * Cin, Cout)


def _fold_and_pack(w_oihw, bn, eps=1e-5):
    """BN fold + MXU packing; done once per block (hoisted out of forward)."""
    scale = bn["gamma"] * jax.lax.rsqrt(bn["var"] + eps)
    bias = bn["beta"] - bn["mean"] * scale
    w_mat = _w_to_mat(w_oihw).astype(jnp.float32) * scale[None, :]
    K, Cout = w_mat.shape
    w_pad = _pad2d(w_mat.astype(jnp.bfloat16),
                   _round_up(K, 128), _round_up(Cout, 128))
    return {"w": w_pad, "b": bias.reshape(1, Cout).astype(jnp.float32)}


def prepare_basic_block_params(params):
    """Precompute folded / padded / bf16 weights once (not in the jitted path)."""
    prep = {"conv1": _fold_and_pack(params["conv1_w"], params["bn1"]),
            "conv2": _fold_and_pack(params["conv2_w"], params["bn2"])}
    if "conv_sc_w" in params:
        prep["conv_sc"] = _fold_and_pack(params["conv_sc_w"], params["bn_sc"])
    return prep


def basic_block_forward(x_nchw, prep, stride):
    """ResNet BasicBlock forward (eval-mode BN). (N,Cin,H,W) -> (N,planes,Ho,Wo)."""
    x = jnp.transpose(x_nchw, (0, 2, 3, 1)).astype(jnp.bfloat16)   # NHWC, bf16
    planes = prep["conv1"]["b"].shape[1]

    # conv1 (3x3, stride, pad 1) + bn1 + ReLU
    p1, (N, Ho, Wo) = _im2col(x, 3, stride, 1)
    M = N * Ho * Wo
    out1 = _fused_conv_bn(p1, prep["conv1"]["w"], prep["conv1"]["b"],
                          relu=True, out_dtype=jnp.bfloat16)        # (M, planes)

    # shortcut: identity, or 1x1 conv (stride) + bn
    if "conv_sc" in prep:
        ps, _ = _im2col(x, 1, stride, 0)
        shortcut = _fused_conv_bn(ps, prep["conv_sc"]["w"], prep["conv_sc"]["b"],
                                  relu=False, out_dtype=jnp.bfloat16)
    else:
        shortcut = x.reshape(M, planes)          # stride == 1 and Cin == planes

    # conv2 (3x3, stride 1, pad 1) + bn2 + residual add + ReLU (one kernel)
    p2, _ = _im2col(out1.reshape(N, Ho, Wo, planes), 3, 1, 1)
    out2 = _fused_conv_bn(p2, prep["conv2"]["w"], prep["conv2"]["b"],
                          relu=True, residual=shortcut, out_dtype=jnp.float32)

    out = out2.reshape(N, Ho, Wo, planes)
    return jnp.transpose(out, (0, 3, 1, 2)).astype(jnp.float32)     # NCHW


# ------------------------------ reference -----------------------------------

def init_basic_block_params(key, in_planes, planes, stride):
    ks = jax.random.split(key, 16)
    f32 = jnp.float32

    def bn(k0, k1, k2, k3, c):
        return dict(
            gamma=1.0 + 0.1 * jax.random.normal(k0, (c,), f32),
            beta=0.1 * jax.random.normal(k1, (c,), f32),
            mean=0.1 * jax.random.normal(k2, (c,), f32),
            var=1.0 + 0.1 * jnp.abs(jax.random.normal(k3, (c,), f32)),
        )

    params = {
        "conv1_w": 0.1 * jax.random.normal(ks[0], (planes, in_planes, 3, 3), f32),
        "bn1": bn(ks[1], ks[2], ks[3], ks[4], planes),
        "conv2_w": 0.1 * jax.random.normal(ks[5], (planes, planes, 3, 3), f32),
        "bn2": bn(ks[6], ks[7], ks[8], ks[9], planes),
    }
    if stride != 1 or in_planes != planes:
        params["conv_sc_w"] = 0.1 * jax.random.normal(
            ks[10], (planes, in_planes, 1, 1), f32)
        params["bn_sc"] = bn(ks[11], ks[12], ks[13], ks[14], planes)
    return params


def reference_forward(x, params, stride, eps=1e-5):
    """Pure-JAX f32 reference (eval-mode BatchNorm), mirrors the nn.Module."""
    def conv(y, w, s, p):
        return jax.lax.conv_general_dilated(
            y, w, window_strides=(s, s), padding=[(p, p), (p, p)],
            dimension_numbers=("NCHW", "OIHW", "NCHW"))

    def bn(y, p):
        scale = p["gamma"] * jax.lax.rsqrt(p["var"] + eps)
        bias = p["beta"] - p["mean"] * scale
        return y * scale[None, :, None, None] + bias[None, :, None, None]

    out = jax.nn.relu(bn(conv(x, params["conv1_w"], stride, 1), params["bn1"]))
    out = bn(conv(out, params["conv2_w"], 1, 1), params["bn2"])
    if "conv_sc_w" in params:
        sc = bn(conv(x, params["conv_sc_w"], stride, 0), params["bn_sc"])
    else:
        sc = x
    return jax.nn.relu(out + sc)


# ------------------------------- main ---------------------------------------

if __name__ == "__main__":
    key = jax.random.PRNGKey(0)
    k_x, k_p = jax.random.split(key)

    # Small shapes consistent with the module: batch=2, in_planes=4, planes=8,
    # spatial=16, stride=2 (exercises the projection shortcut).
    N, in_planes, H, W = 2, 4, 16, 16
    planes, stride = 8, 2

    x = jax.random.normal(k_x, (N, in_planes, H, W), jnp.float32)
    params = init_basic_block_params(k_p, in_planes, planes, stride)
    prep = prepare_basic_block_params(params)      # BN fold / pack, once

    forward = jax.jit(basic_block_forward, static_argnames=("stride",))
    out = jax.block_until_ready(forward(x, prep, stride=stride))

    assert out.shape == (N, planes, H // stride, W // stride), out.shape
    assert bool(jnp.all(out >= 0.0))               # final ReLU

    # Loose tolerance: MXU operands and intermediates are bf16 by design.
    ref = reference_forward(x, params, stride)
    max_err = float(jnp.max(jnp.abs(out - ref)))
    assert max_err < 0.1, f"max abs error vs f32 reference: {max_err}"

    print("KERNEL_OK")
</pallas_src>

<mosaic_0001>
module attributes {stable_mosaic.version = 11 : i64} {
  func.func @_mm_epilogue_kernel(%arg0: i32, %arg1: memref<64x128xbf16, #tpu.memory_space<vmem>>, %arg2: memref<128x128xbf16, #tpu.memory_space<vmem>>, %arg3: memref<1x128xf32, #tpu.memory_space<vmem>>, %arg4: memref<64x128xbf16, #tpu.memory_space<vmem>>) attributes {dimension_semantics = [#tpu.dimension_semantics<parallel>], iteration_bounds = array<i64: 2>, scalar_prefetch = 0 : i64, scratch_operands = 0 : i64, tpu.core_type = #tpu.core_type<tc>, window_params = [{transform_indices = @transform_0, window_bounds = array<i64: 64, 128>}, {pipeline_mode = #tpu.pipeline_mode<synchronous>, transform_indices = @transform_1, window_bounds = array<i64: 128, 128>}, {pipeline_mode = #tpu.pipeline_mode<synchronous>, transform_indices = @transform_2, window_bounds = array<i64: 1, 128>}, {transform_indices = @transform_3, window_bounds = array<i64: 64, 128>}]} {
    %c0 = arith.constant 0 : index
    %c0_0 = arith.constant 0 : index
    %0 = vector.load %arg1[%c0, %c0_0] : memref<64x128xbf16, #tpu.memory_space<vmem>>, vector<64x128xbf16>
    %c0_1 = arith.constant 0 : index
    %c0_2 = arith.constant 0 : index
    %1 = vector.load %arg2[%c0_1, %c0_2] : memref<128x128xbf16, #tpu.memory_space<vmem>>, vector<128x128xbf16>
    %cst = arith.constant dense<0.000000e+00> : vector<64x128xf32>
    %2 = tpu.matmul %0, %1, %cst {dimension_numbers = #tpu.dot_dimension_numbers<[1], [0], [0], [1], [0, 0, 1, 1], [], []>} : vector<64x128xbf16>, vector<128x128xbf16>, vector<64x128xf32> -> vector<64x128xf32>
    %c0_3 = arith.constant 0 : index
    %c0_4 = arith.constant 0 : index
    %3 = vector.load %arg3[%c0_3, %c0_4] : memref<1x128xf32, #tpu.memory_space<vmem>>, vector<1x128xf32>
    %4 = vector.broadcast %3 : vector<1x128xf32> to vector<64x128xf32>
    %5 = arith.addf %2, %4 : vector<64x128xf32>
    %cst_5 = arith.constant 0.000000e+00 : f32
    %6 = vector.broadcast %cst_5 : f32 to vector<64x128xf32>
    %7 = arith.maximumf %5, %6 : vector<64x128xf32>
    %8 = arith.truncf %7 : vector<64x128xf32> to vector<64x128xbf16>
    %c0_6 = arith.constant 0 : index
    %c0_7 = arith.constant 0 : index
    %9 = vector.load %arg4[%c0_6, %c0_7] : memref<64x128xbf16, #tpu.memory_space<vmem>>, vector<64x128xbf16>
    tpu.vector_store %arg4[%c0_6, %c0_7], %8 {strides = array<i32>} : memref<64x128xbf16, #tpu.memory_space<vmem>>, vector<64x128xbf16>,
    return
  }
  func.func @transform_0(%arg0: i32) -> (i32, i32) {
    %c0_i32 = arith.constant 0 : i32
    %c0_i32_0 = arith.constant 0 : i32
    return %arg0, %c0_i32 : i32, i32
  }
  func.func @transform_1(%arg0: i32) -> (i32, i32) {
    %c0_i32 = arith.constant 0 : i32
    %c0_i32_0 = arith.constant 0 : i32
    %c0_i32_1 = arith.constant 0 : i32
    return %c0_i32, %c0_i32_0 : i32, i32
  }
  func.func @transform_2(%arg0: i32) -> (i32, i32) {
    %c0_i32 = arith.constant 0 : i32
    %c0_i32_0 = arith.constant 0 : i32
    %c0_i32_1 = arith.constant 0 : i32
    return %c0_i32, %c0_i32_0 : i32, i32
  }
  func.func @transform_3(%arg0: i32) -> (i32, i32) {
    %c0_i32 = arith.constant 0 : i32
    %c0_i32_0 = arith.constant 0 : i32
    return %arg0, %c0_i32 : i32, i32
  }
}

module attributes {stable_mosaic.version = 11 : i64} {
  func.func @_mm_epilogue_kernel(%arg0: i32, %arg1: memref<64x128xbf16, #tpu.memory_space<vmem>>, %arg2: memref<128x128xbf16, #tpu.memory_space<vmem>>, %arg3: memref<1x128xf32, #tpu.memory_space<vmem>>, %arg4: memref<64x128xbf16, #tpu.memory_space<vmem>>) attributes {dimension_semantics = [#tpu.dimension_semantics<parallel>], iteration_bounds = array<i64: 2>, scalar_prefetch = 0 : i64, scratch_operands = 0 : i64, tpu.core_type = #tpu.core_type<tc>, window_params = [{transform_indices = @transform_0, window_bounds = array<i64: 64, 128>}, {pipeline_mode = #tpu.pipeline_mode<synchronous>, transform_indices = @transform_1, window_bounds = array<i64: 128, 128>}, {pipeline_mode = #tpu.pipeline_mode<synchronous>, transform_indices = @transform_2, window_bounds = array<i64: 1, 128>}, {transform_indices = @transform_3, window_bounds = array<i64: 64, 128>}]} {
    %c0 = arith.constant 0 : index
    %c0_0 = arith.constant 0 : index
    %0 = vector.load %arg1[%c0, %c0_0] : memref<64x128xbf16, #tpu.memory_space<vmem>>, vector<64x128xbf16>
    %c0_1 = arith.constant 0 : index
    %c0_2 = arith.constant 0 : index
    %1 = vector.load %arg2[%c0_1, %c0_2] : memref<128x128xbf16, #tpu.memory_space<vmem>>, vector<128x128xbf16>
    %cst = arith.constant dense<0.000000e+00> : vector<64x128xf32>
    %2 = tpu.matmul %0, %1, %cst {dimension_numbers = #tpu.dot_dimension_numbers<[1], [0], [0], [1], [0, 0, 1, 1], [], []>} : vector<64x128xbf16>, vector<128x128xbf16>, vector<64x128xf32> -> vector<64x128xf32>
    %c0_3 = arith.constant 0 : index
    %c0_4 = arith.constant 0 : index
    %3 = vector.load %arg3[%c0_3, %c0_4] : memref<1x128xf32, #tpu.memory_space<vmem>>, vector<1x128xf32>
    %4 = vector.broadcast %3 : vector<1x128xf32> to vector<64x128xf32>
    %5 = arith.addf %2, %4 : vector<64x128xf32>
    %6 = arith.truncf %5 : vector<64x128xf32> to vector<64x128xbf16>
    %c0_5 = arith.constant 0 : index
    %c0_6 = arith.constant 0 : index
    %7 = vector.load %arg4[%c0_5, %c0_6] : memref<64x128xbf16, #tpu.memory_space<vmem>>, vector<64x128xbf16>
    tpu.vector_store %arg4[%c0_5, %c0_6], %6 {strides = array<i32>} : memref<64x128xbf16, #tpu.memory_space<vmem>>, vector<64x128xbf16>,
    return
  }
  func.func @transform_0(%arg0: i32) -> (i32, i32) {
    %c0_i32 = arith.constant 0 : i32
    %c0_i32_0 = arith.constant 0 : i32
    return %arg0, %c0_i32 : i32, i32
  }
  func.func @transform_1(%arg0: i32) -> (i32, i32) {
    %c0_i32 = arith.constant 0 : i32
    %c0_i32_0 = arith.constant 0 : i32
    %c0_i32_1 = arith.constant 0 : i32
    return %c0_i32, %c0_i32_0 : i32, i32
  }
  func.func @transform_2(%arg0: i32) -> (i32, i32) {
    %c0_i32 = arith.constant 0 : i32
    %c0_i32_0 = arith.constant 0 : i32
    %c0_i32_1 = arith.constant 0 : i32
    return %c0_i32, %c0_i32_0 : i32, i32
  }
  func.func @transform_3(%arg0: i32) -> (i32, i32) {
    %c0_i32 = arith.constant 0 : i32
    %c0_i32_0 = arith.constant 0 : i32
    return %arg0, %c0_i32 : i32, i32
  }
}

module attributes {stable_mosaic.version = 11 : i64} {
  func.func @_mm_epilogue_kernel(%arg0: i32, %arg1: memref<64x128xbf16, #tpu.memory_space<vmem>>, %arg2: memref<128x128xbf16, #tpu.memory_space<vmem>>, %arg3: memref<1x128xf32, #tpu.memory_space<vmem>>, %arg4: memref<64x128xbf16, #tpu.memory_space<vmem>>, %arg5: memref<64x128xf32, #tpu.memory_space<vmem>>) attributes {dimension_semantics = [#tpu.dimension_semantics<parallel>], iteration_bounds = array<i64: 2>, scalar_prefetch = 0 : i64, scratch_operands = 0 : i64, tpu.core_type = #tpu.core_type<tc>, window_params = [{transform_indices = @transform_0, window_bounds = array<i64: 64, 128>}, {pipeline_mode = #tpu.pipeline_mode<synchronous>, transform_indices = @transform_1, window_bounds = array<i64: 128, 128>}, {pipeline_mode = #tpu.pipeline_mode<synchronous>, transform_indices = @transform_2, window_bounds = array<i64: 1, 128>}, {transform_indices = @transform_3, window_bounds = array<i64: 64, 128>}, {transform_indices = @transform_4, window_bounds = array<i64: 64, 128>}]} {
    %c0 = arith.constant 0 : index
    %c0_0 = arith.constant 0 : index
    %0 = vector.load %arg1[%c0, %c0_0] : memref<64x128xbf16, #tpu.memory_space<vmem>>, vector<64x128xbf16>
    %c0_1 = arith.constant 0 : index
    %c0_2 = arith.constant 0 : index
    %1 = vector.load %arg2[%c0_1, %c0_2] : memref<128x128xbf16, #tpu.memory_space<vmem>>, vector<128x128xbf16>
    %cst = arith.constant dense<0.000000e+00> : vector<64x128xf32>
    %2 = tpu.matmul %0, %1, %cst {dimension_numbers = #tpu.dot_dimension_numbers<[1], [0], [0], [1], [0, 0, 1, 1], [], []>} : vector<64x128xbf16>, vector<128x128xbf16>, vector<64x128xf32> -> vector<64x128xf32>
    %c0_3 = arith.constant 0 : index
    %c0_4 = arith.constant 0 : index
    %3 = vector.load %arg3[%c0_3, %c0_4] : memref<1x128xf32, #tpu.memory_space<vmem>>, vector<1x128xf32>
    %4 = vector.broadcast %3 : vector<1x128xf32> to vector<64x128xf32>
    %5 = arith.addf %2, %4 : vector<64x128xf32>
    %c0_5 = arith.constant 0 : index
    %c0_6 = arith.constant 0 : index
    %6 = vector.load %arg4[%c0_5, %c0_6] : memref<64x128xbf16, #tpu.memory_space<vmem>>, vector<64x128xbf16>
    %7 = arith.extf %6 : vector<64x128xbf16> to vector<64x128xf32>
    %8 = arith.addf %5, %7 : vector<64x128xf32>
    %cst_7 = arith.constant 0.000000e+00 : f32
    %9 = vector.broadcast %cst_7 : f32 to vector<64x128xf32>
    %10 = arith.maximumf %8, %9 : vector<64x128xf32>
    %c0_8 = arith.constant 0 : index
    %c0_9 = arith.constant 0 : index
    %11 = vector.load %arg5[%c0_8, %c0_9] : memref<64x128xf32, #tpu.memory_space<vmem>>, vector<64x128xf32>
    tpu.vector_store %arg5[%c0_8, %c0_9], %10 {strides = array<i32>} : memref<64x128xf32, #tpu.memory_space<vmem>>, vector<64x128xf32>,
    return
  }
  func.func @transform_0(%arg0: i32) -> (i32, i32) {
    %c0_i32 = arith.constant 0 : i32
    %c0_i32_0 = arith.constant 0 : i32
    return %arg0, %c0_i32 : i32, i32
  }
  func.func @transform_1(%arg0: i32) -> (i32, i32) {
    %c0_i32 = arith.constant 0 : i32
    %c0_i32_0 = arith.constant 0 : i32
    %c0_i32_1 = arith.constant 0 : i32
    return %c0_i32, %c0_i32_0 : i32, i32
  }
  func.func @transform_2(%arg0: i32) -> (i32, i32) {
    %c0_i32 = arith.constant 0 : i32
    %c0_i32_0 = arith.constant 0 : i32
    %c0_i32_1 = arith.constant 0 : i32
    return %c0_i32, %c0_i32_0 : i32, i32
  }
  func.func @transform_3(%arg0: i32) -> (i32, i32) {
    %c0_i32 = arith.constant 0 : i32
    %c0_i32_0 = arith.constant 0 : i32
    return %arg0, %c0_i32 : i32, i32
  }
  func.func @transform_4(%arg0: i32) -> (i32, i32) {
    %c0_i32 = arith.constant 0 : i32
    %c0_i32_0 = arith.constant 0 : i32
    return %arg0, %c0_i32 : i32, i32
  }
}

</mosaic_0001>

<bundles_post_ra>
// kernel: basic_block_forward.3
= control target key start
LH: loop header
LB: loop body
LE: loop exit
PB: predicated region body
PF: predicated region fallthrough
CT: control target
= control target key end

     0   :  { %s538_s12 = smov 0   ;;  %s589_s0 = inlined_call_operand.vmem [shape: bf16[128,128], index: 0, kind: input, shape index: {}]   ;;  %s590_s1 = inlined_call_operand.vmem [shape: bf16[128,128], index: 1, kind: input, shape index: {}]   ;;  %s591_s2 = inlined_call_operand.vmem [shape: f32[1,128], index: 2, kind: input, shape index: {}]   ;;  %s592_s3 = inlined_call_operand.vmem [shape: bf16[128,128], index: 3, kind: output, shape index: {}]  }
   0x1 LB: > { %s383_s13 = sadd.s32 4294967295, %s516_s12   ;;  %p387_p0 = scmp.ge.s32.totalorder %s516_s12, 1  ;;  %s516_s12 = sphi %s538_s12, %s13_s12  }
   0x2   : > { %p138_p1 = scmp.lt.s32.totalorder %s516_s12, 3 }
   0x4   : > { %p139_p2 = pnand %p387_p0, %p138_p1 }
   0x5   : > { %s388_s22 = sshll.u32 (!%p139_p2), %s383_s13, 3 }
   0x6   : > { %142 = sbr.rel (%p139_p2) target bundleno = 192 (0xc0), region = 32  ;;  %p163_p3 = scmp.lt.s32.totalorder (!%p139_p2), %s388_s22, 15 }
   0xb   : > { %v453_v0 = vld [vmem:[%s590_s1 + $0x38] sm:$0xff]  ;;  %v452_v1 = vld [vmem:[%s590_s1 + $0x30] sm:$0xff]  ;;  %v451_v2 = vld [vmem:[%s590_s1 + $0x28] sm:$0xff]  ;;  %s594_s22 = smov (!%p163_p3, %s388_s22), 15 }
   0xc   : > { %274 = vmatpush.bf16.msra.mxu0 %v453_v0  ;;  %477 = vmatpush.bf16.msra.mxu1 %v453_v0  ;;  %v450_v3 = vld [vmem:[%s590_s1 + $0x20] sm:$0xff]  ;;  %v449_v4 = vld [vmem:[%s590_s1 + $0x18] sm:$0xff]  ;;  %v448_v5 = vld [vmem:[%s590_s1 + $0x10] sm:$0xff]  ;;  %s389_s29 = sshll.u32 %s594_s22, 2 }
   0xd   : > { %478 = vmatpush.bf16.msra.mxu2 %v453_v0  ;;  %479 = vmatpush.bf16.msra.mxu3 %v453_v0  ;;  %v447_v6 = vld [vmem:[%s590_s1 + $0x8] sm:$0xff]  ;;  %v446_v7 = vld [vmem:[%s590_s1] sm:$0xff]  ;;  %s166_s7 = scalar_lea.vmem %s589_s0, %s389_s29  ;;  %s172_s13 = scalar_lea.vmem %s592_s3, %s389_s29 }
   0xe   : > { %v442_v8 = vld [vmem:[%s166_s7] sm:$0xff]  ;;  %v443_v9 = vld [vmem:[%s166_s7 + $0x8] sm:$0xff]  ;;  %v444_v10 = vld [vmem:[%s166_s7 + $0x10] sm:$0xff] }
   0xf   : > { %v445_v11 = vld [vmem:[%s166_s7 + $0x18] sm:$0xff]  ;;  %v509_v14 = vld [vmem:[%s591_s2] ss:$0 sm:$0xff] }
  0x10   : > { %275 = vmatpush.bf16.msra.mxu0 %v452_v1  ;;  %480 = vmatpush.bf16.msra.mxu1 %v452_v1 }
  0x11   : > { %481 = vmatpush.bf16.msra.mxu2 %v452_v1  ;;  %482 = vmatpush.bf16.msra.mxu3 %v452_v1 }
  0x14   : > { %276 = vmatpush.bf16.msra.mxu0 %v451_v2  ;;  %483 = vmatpush.bf16.msra.mxu1 %v451_v2 }
  0x15   : > { %484 = vmatpush.bf16.msra.mxu2 %v451_v2  ;;  %485 = vmatpush.bf16.msra.mxu3 %v451_v2 }
  0x18   : > { %277 = vmatpush.bf16.msra.mxu0 %v450_v3  ;;  %486 = vmatpush.bf16.msra.mxu1 %v450_v3 }
  0x19   : > { %487 = vmatpush.bf16.msra.mxu2 %v450_v3  ;;  %488 = vmatpush.bf16.msra.mxu3 %v450_v3 }
  0x1c   : > { %278 = vmatpush.bf16.msra.mxu0 %v449_v4  ;;  %489 = vmatpush.bf16.msra.mxu1 %v449_v4 }
  0x1d   : > { %490 = vmatpush.bf16.msra.mxu2 %v449_v4  ;;  %491 = vmatpush.bf16.msra.mxu3 %v449_v4 }
  0x20   : > { %279 = vmatpush.bf16.msra.mxu0 %v448_v5  ;;  %492 = vmatpush.bf16.msra.mxu1 %v448_v5 }
  0x21   : > { %493 = vmatpush.bf16.msra.mxu2 %v448_v5  ;;  %494 = vmatpush.bf16.msra.mxu3 %v448_v5 }
  0x24   : > { %280 = vmatpush.bf16.msra.mxu0 %v447_v6  ;;  %495 = vmatpush.bf16.msra.mxu1 %v447_v6 }
  0x25   : > { %496 = vmatpush.bf16.msra.mxu2 %v447_v6  ;;  %497 = vmatpush.bf16.msra.mxu3 %v447_v6 }
  0x28   : > { %281 = vmatpush.bf16.msra.mxu0 %v446_v7  ;;  %498 = vmatpush.bf16.msra.mxu1 %v446_v7 }
  0x29   : > { %499 = vmatpush.bf16.msra.mxu2 %v446_v7  ;;  %500 = vmatpush.bf16.msra.mxu3 %v446_v7 }
  0x2b   : > { %282 = vmatmul.bf16.vlgmr.msra.gmra.mxu0 %v442_v8  ;;  %287 = vmatmul.bf16.vlgmr.msra.gmra.mxu1 %v443_v9 }
  0x2c   : > { %292 = vmatmul.bf16.vlgmr.msra.gmra.mxu2 %v444_v10  ;;  %297 = vmatmul.bf16.vlgmr.msra.gmra.mxu3 %v445_v11 }
  0xa8   : > { %v283_v12 = vpop.f32.mrf.mxu0  ;;  %v288_v13 = vpop.f32.mrf.mxu1 }
  0xa9   : > { %v284_v15 = vadd.f32 %v509_v14, %v283_v12  ;;  %v289_v16 = vadd.f32 %v509_v14, %v288_v13 }
  0xab   : > { %v303_v23 = vmax.f32 %v284_v15, 0.0  ;;  %v305_v24 = vmax.f32 %v289_v16, 0.0 }
  0xaf   : > { %v293_v17 = vpop.f32.mrf.mxu2  ;;  %v298_v18 = vpop.f32.mrf.mxu3 }
  0xb0   : > { %v285_v19 = vpop.f32.mrf.mxu0  ;;  %v290_v20 = vpop.f32.mrf.mxu1  ;;  %v294_v29 = vadd.f32 %v509_v14, %v293_v17  ;;  %v299_v30 = vadd.f32 %v509_v14, %v298_v18 }
  0xb1   : > { %v286_v21 = vadd.f32 %v509_v14, %v285_v19  ;;  %v291_v22 = vadd.f32 %v509_v14, %v290_v20 }
  0xb2   : > { %v307_v35 = vmax.f32 %v294_v29, 0.0  ;;  %v309_v36 = vmax.f32 %v299_v30, 0.0 }
  0xb3   : > { %v304_v25 = vmax.f32 %v286_v21, 0.0  ;;  %v306_v26 = vmax.f32 %v291_v22, 0.0 }
  0xb5   : > { %v457_v27 = vpack.c.bf16 %v304_v25, %v303_v23  ;;  %v462_v28 = vpack.c.bf16 %v306_v26, %v305_v24 }
  0xb7   : > { %458 = vst [vmem:[%s172_s13] sm:$0xff] %v457_v27   ;;  %v295_v31 = vpop.f32.mrf.mxu2  ;;  %v300_v32 = vpop.f32.mrf.mxu3 }
  0xb8   : > { %474 = vst [vmem:[%s172_s13 + $0x8] sm:$0xff] %v462_v28   ;;  %v296_v33 = vadd.f32 %v509_v14, %v295_v31  ;;  %v301_v34 = vadd.f32 %v509_v14, %v300_v32 }
  0xba   : > { %v308_v37 = vmax.f32 %v296_v33, 0.0  ;;  %v310_v38 = vmax.f32 %v301_v34, 0.0 }
  0xbc   : > { %v467_v39 = vpack.c.bf16 %v308_v37, %v307_v35  ;;  %v472_v40 = vpack.c.bf16 %v310_v38, %v309_v36 }
  0xbe   : > { %475 = vst [vmem:[%s172_s13 + $0x10] sm:$0xff] %v467_v39  }
  0xbf   : > { %476 = vst [vmem:[%s172_s13 + $0x18] sm:$0xff] %v472_v40  }
  0xc0 PF: > { %s13_s12 = sadd.s32 1, %s516_s12  }
  0xc1   : > { %p10_p4 = scmp.ge.s32.totalorder %s13_s12, 4  }
  0xc3   :  { %12 = sbr.rel (!%p10_p4) target bundleno = 1 (0x1), region = 62 }

// kernel: basic_block_forward.4
= control target key start
LH: loop header
LB: loop body
LE: loop exit
PB: predicated region body
PF: predicated region fallthrough
CT: control target
= control target key end

     0   :  { %s530_s12 = smov 0   ;;  %s581_s0 = inlined_call_operand.vmem [shape: bf16[128,128], index: 0, kind: input, shape index: {}]   ;;  %s582_s1 = inlined_call_operand.vmem [shape: bf16[128,128], index: 1, kind: input, shape index: {}]   ;;  %s583_s2 = inlined_call_operand.vmem [shape: f32[1,128], index: 2, kind: input, shape index: {}]   ;;  %s584_s3 = inlined_call_operand.vmem [shape: bf16[128,128], index: 3, kind: output, shape index: {}]  }
   0x1 LB: > { %s375_s13 = sadd.s32 4294967295, %s508_s12   ;;  %p379_p0 = scmp.ge.s32.totalorder %s508_s12, 1  ;;  %s508_s12 = sphi %s530_s12, %s13_s12  }
   0x2   : > { %p138_p1 = scmp.lt.s32.totalorder %s508_s12, 3 }
   0x4   : > { %p139_p2 = pnand %p379_p0, %p138_p1 }
   0x5   : > { %s380_s22 = sshll.u32 (!%p139_p2), %s375_s13, 3 }
   0x6   : > { %142 = sbr.rel (%p139_p2) target bundleno = 190 (0xbe), region = 32  ;;  %p163_p3 = scmp.lt.s32.totalorder (!%p139_p2), %s380_s22, 15 }
   0xb   : > { %v445_v0 = vld [vmem:[%s582_s1 + $0x38] sm:$0xff]  ;;  %v444_v1 = vld [vmem:[%s582_s1 + $0x30] sm:$0xff]  ;;  %v443_v2 = vld [vmem:[%s582_s1 + $0x28] sm:$0xff]  ;;  %s586_s22 = smov (!%p163_p3, %s380_s22), 15 }
   0xc   : > { %274 = vmatpush.bf16.msra.mxu0 %v445_v0  ;;  %469 = vmatpush.bf16.msra.mxu1 %v445_v0  ;;  %v442_v3 = vld [vmem:[%s582_s1 + $0x20] sm:$0xff]  ;;  %v441_v4 = vld [vmem:[%s582_s1 + $0x18] sm:$0xff]  ;;  %v440_v5 = vld [vmem:[%s582_s1 + $0x10] sm:$0xff]  ;;  %s381_s29 = sshll.u32 %s586_s22, 2 }
   0xd   : > { %470 = vmatpush.bf16.msra.mxu2 %v445_v0  ;;  %471 = vmatpush.bf16.msra.mxu3 %v445_v0  ;;  %v439_v6 = vld [vmem:[%s582_s1 + $0x8] sm:$0xff]  ;;  %v438_v7 = vld [vmem:[%s582_s1] sm:$0xff]  ;;  %s166_s7 = scalar_lea.vmem %s581_s0, %s381_s29  ;;  %s172_s13 = scalar_lea.vmem %s584_s3, %s381_s29 }
   0xe   : > { %v434_v8 = vld [vmem:[%s166_s7] sm:$0xff]  ;;  %v435_v9 = vld [vmem:[%s166_s7 + $0x8] sm:$0xff]  ;;  %v436_v10 = vld [vmem:[%s166_s7 + $0x10] sm:$0xff] }
   0xf   : > { %v437_v11 = vld [vmem:[%s166_s7 + $0x18] sm:$0xff]  ;;  %v501_v14 = vld [vmem:[%s583_s2] ss:$0 sm:$0xff] }
  0x10   : > { %275 = vmatpush.bf16.msra.mxu0 %v444_v1  ;;  %472 = vmatpush.bf16.msra.mxu1 %v444_v1 }
  0x11   : > { %473 = vmatpush.bf16.msra.mxu2 %v444_v1  ;;  %474 = vmatpush.bf16.msra.mxu3 %v444_v1 }
  0x14   : > { %276 = vmatpush.bf16.msra.mxu0 %v443_v2  ;;  %475 = vmatpush.bf16.msra.mxu1 %v443_v2 }
  0x15   : > { %476 = vmatpush.bf16.msra.mxu2 %v443_v2  ;;  %477 = vmatpush.bf16.msra.mxu3 %v443_v2 }
  0x18   : > { %277 = vmatpush.bf16.msra.mxu0 %v442_v3  ;;  %478 = vmatpush.bf16.msra.mxu1 %v442_v3 }
  0x19   : > { %479 = vmatpush.bf16.msra.mxu2 %v442_v3  ;;  %480 = vmatpush.bf16.msra.mxu3 %v442_v3 }
  0x1c   : > { %278 = vmatpush.bf16.msra.mxu0 %v441_v4  ;;  %481 = vmatpush.bf16.msra.mxu1 %v441_v4 }
  0x1d   : > { %482 = vmatpush.bf16.msra.mxu2 %v441_v4  ;;  %483 = vmatpush.bf16.msra.mxu3 %v441_v4 }
  0x20   : > { %279 = vmatpush.bf16.msra.mxu0 %v440_v5  ;;  %484 = vmatpush.bf16.msra.mxu1 %v440_v5 }
  0x21   : > { %485 = vmatpush.bf16.msra.mxu2 %v440_v5  ;;  %486 = vmatpush.bf16.msra.mxu3 %v440_v5 }
  0x24   : > { %280 = vmatpush.bf16.msra.mxu0 %v439_v6  ;;  %487 = vmatpush.bf16.msra.mxu1 %v439_v6 }
  0x25   : > { %488 = vmatpush.bf16.msra.mxu2 %v439_v6  ;;  %489 = vmatpush.bf16.msra.mxu3 %v439_v6 }
  0x28   : > { %281 = vmatpush.bf16.msra.mxu0 %v438_v7  ;;  %490 = vmatpush.bf16.msra.mxu1 %v438_v7 }
  0x29   : > { %491 = vmatpush.bf16.msra.mxu2 %v438_v7  ;;  %492 = vmatpush.bf16.msra.mxu3 %v438_v7 }
  0x2b   : > { %282 = vmatmul.bf16.vlgmr.msra.gmra.mxu0 %v434_v8  ;;  %287 = vmatmul.bf16.vlgmr.msra.gmra.mxu1 %v435_v9 }
  0x2c   : > { %292 = vmatmul.bf16.vlgmr.msra.gmra.mxu2 %v436_v10  ;;  %297 = vmatmul.bf16.vlgmr.msra.gmra.mxu3 %v437_v11 }
  0xa8   : > { %v283_v12 = vpop.f32.mrf.mxu0  ;;  %v288_v13 = vpop.f32.mrf.mxu1 }
  0xa9   : > { %v284_v19 = vadd.f32 %v501_v14, %v283_v12  ;;  %v289_v20 = vadd.f32 %v501_v14, %v288_v13 }
  0xaf   : > { %v293_v15 = vpop.f32.mrf.mxu2  ;;  %v298_v16 = vpop.f32.mrf.mxu3 }
  0xb0   : > { %v285_v17 = vpop.f32.mrf.mxu0  ;;  %v290_v18 = vpop.f32.mrf.mxu1  ;;  %v294_v27 = vadd.f32 %v501_v14, %v293_v15  ;;  %v299_v28 = vadd.f32 %v501_v14, %v298_v16 }
  0xb1   : > { %v286_v21 = vadd.f32 %v501_v14, %v285_v17  ;;  %v291_v22 = vadd.f32 %v501_v14, %v290_v18 }
  0xb3   : > { %v449_v23 = vpack.c.bf16 %v286_v21, %v284_v19  ;;  %v454_v24 = vpack.c.bf16 %v291_v22, %v289_v20 }
  0xb5   : > { %450 = vst [vmem:[%s172_s13] sm:$0xff] %v449_v23  }
  0xb6   : > { %466 = vst [vmem:[%s172_s13 + $0x8] sm:$0xff] %v454_v24  }
  0xb7   : > { %v295_v25 = vpop.f32.mrf.mxu2  ;;  %v300_v26 = vpop.f32.mrf.mxu3 }
  0xb8   : > { %v296_v29 = vadd.f32 %v501_v14, %v295_v25  ;;  %v301_v30 = vadd.f32 %v501_v14, %v300_v26 }
  0xba   : > { %v459_v31 = vpack.c.bf16 %v296_v29, %v294_v27  ;;  %v464_v32 = vpack.c.bf16 %v301_v30, %v299_v28 }
  0xbc   : > { %467 = vst [vmem:[%s172_s13 + $0x10] sm:$0xff] %v459_v31  }
  0xbd   : > { %468 = vst [vmem:[%s172_s13 + $0x18] sm:$0xff] %v464_v32  }
  0xbe PF: > { %s13_s12 = sadd.s32 1, %s508_s12  }
  0xbf   : > { %p10_p4 = scmp.ge.s32.totalorder %s13_s12, 4  }
  0xc1   :  { %12 = sbr.rel (!%p10_p4) target bundleno = 1 (0x1), region = 62 }

// kernel: basic_block_forward.5
= control target key start
LH: loop header
LB: loop body
LE: loop exit
PB: predicated region body
PF: predicated region fallthrough
CT: control target
= control target key end

     0   :  { %s618_s15 = smov 0   ;;  %s679_s0 = inlined_call_operand.vmem [shape: bf16[128,128], index: 0, kind: input, shape index: {}]   ;;  %s680_s1 = inlined_call_operand.vmem [shape: bf16[128,128], index: 1, kind: input, shape index: {}]   ;;  %s681_s2 = inlined_call_operand.vmem [shape: f32[1,128], index: 2, kind: input, shape index: {}]   ;;  %s682_s3 = inlined_call_operand.vmem [shape: bf16[128,128], index: 3, kind: input, shape index: {}]   ;;  %s683_s4 = inlined_call_operand.vmem [shape: f32[128,128], index: 4, kind: output, shape index: {}]  }
   0x1 LB: > { %s460_s16 = sadd.s32 4294967295, %s591_s15   ;;  %p464_p0 = scmp.ge.s32.totalorder %s591_s15, 1  ;;  %s591_s15 = sphi %s618_s15, %s14_s15  }
   0x2   : > { %p174_p1 = scmp.lt.s32.totalorder %s591_s15, 3 }
   0x4   : > { %p175_p2 = pnand %p464_p0, %p174_p1 }
   0x5   : > { %s465_s25 = sshll.u32 (!%p175_p2), %s460_s16, 3 }
   0x6   : > { %178 = sbr.rel (%p175_p2) target bundleno = 192 (0xc0), region = 36  ;;  %p206_p3 = scmp.lt.s32.totalorder (!%p175_p2), %s465_s25, 15 }
   0xb   : > { %v532_v0 = vld [vmem:[%s680_s1 + $0x38] sm:$0xff]  ;;  %v531_v1 = vld [vmem:[%s680_s1 + $0x30] sm:$0xff]  ;;  %v530_v2 = vld [vmem:[%s680_s1 + $0x28] sm:$0xff]  ;;  %s685_s25 = smov (!%p206_p3, %s465_s25), 15 }
   0xc   : > { %323 = vmatpush.bf16.msra.mxu0 %v532_v0  ;;  %552 = vmatpush.bf16.msra.mxu1 %v532_v0  ;;  %v529_v3 = vld [vmem:[%s680_s1 + $0x20] sm:$0xff]  ;;  %v528_v4 = vld [vmem:[%s680_s1 + $0x18] sm:$0xff]  ;;  %v527_v5 = vld [vmem:[%s680_s1 + $0x10] sm:$0xff]  ;;  %s466_s6 = sshll.u32 %s685_s25, 2  ;;  %s470_s18 = sshll.u32 %s685_s25, 3 }
   0xd   : > { %553 = vmatpush.bf16.msra.mxu2 %v532_v0  ;;  %554 = vmatpush.bf16.msra.mxu3 %v532_v0  ;;  %v526_v6 = vld [vmem:[%s680_s1 + $0x8] sm:$0xff]  ;;  %v525_v7 = vld [vmem:[%s680_s1] sm:$0xff]  ;;  %s209_s11 = scalar_lea.vmem %s679_s0, %s466_s6  ;;  %s215_s14 = scalar_lea.vmem %s682_s3, %s466_s6 }
   0xe   : > { %v521_v8 = vld [vmem:[%s209_s11] sm:$0xff]  ;;  %v522_v9 = vld [vmem:[%s209_s11 + $0x8] sm:$0xff]  ;;  %v523_v10 = vld [vmem:[%s209_s11 + $0x10] sm:$0xff]  ;;  %s666_s21 = scalar_lea.vmem %s683_s4, %s470_s18 }
   0xf   : > { %v524_v11 = vld [vmem:[%s209_s11 + $0x18] sm:$0xff]  ;;  %v534_v12 = vld [vmem:[%s215_s14] sm:$0xff]   ;;  %v549_v13 = vld [vmem:[%s215_s14 + $0x8] sm:$0xff]  }
  0x10   : > { %324 = vmatpush.bf16.msra.mxu0 %v531_v1  ;;  %555 = vmatpush.bf16.msra.mxu1 %v531_v1  ;;  %v584_v14 = vld [vmem:[%s681_s2] ss:$0 sm:$0xff]  ;;  %v535_v15 = vunpack.c.l.bf16 %v534_v12  ;;  %v539_v16 = vunpack.c.l.bf16 %v549_v13  ;;  %v550_v23 = vld [vmem:[%s215_s14 + $0x10] sm:$0xff]   ;;  %v551_v24 = vld [vmem:[%s215_s14 + $0x18] sm:$0xff]   ;;  %v536_v31 = vunpack.c.h.bf16 %v534_v12  ;;  %v540_v32 = vunpack.c.h.bf16 %v549_v13 }
  0x11   : > { %556 = vmatpush.bf16.msra.mxu2 %v531_v1  ;;  %557 = vmatpush.bf16.msra.mxu3 %v531_v1  ;;  %v543_v27 = vunpack.c.l.bf16 %v550_v23  ;;  %v547_v28 = vunpack.c.l.bf16 %v551_v24  ;;  %v544_v47 = vunpack.c.h.bf16 %v550_v23  ;;  %v548_v48 = vunpack.c.h.bf16 %v551_v24 }
  0x14   : > { %325 = vmatpush.bf16.msra.mxu0 %v530_v2  ;;  %558 = vmatpush.bf16.msra.mxu1 %v530_v2 }
  0x15   : > { %559 = vmatpush.bf16.msra.mxu2 %v530_v2  ;;  %560 = vmatpush.bf16.msra.mxu3 %v530_v2 }
  0x18   : > { %326 = vmatpush.bf16.msra.mxu0 %v529_v3  ;;  %561 = vmatpush.bf16.msra.mxu1 %v529_v3 }
  0x19   : > { %562 = vmatpush.bf16.msra.mxu2 %v529_v3  ;;  %563 = vmatpush.bf16.msra.mxu3 %v529_v3 }
  0x1c   : > { %327 = vmatpush.bf16.msra.mxu0 %v528_v4  ;;  %564 = vmatpush.bf16.msra.mxu1 %v528_v4 }
  0x1d   : > { %565 = vmatpush.bf16.msra.mxu2 %v528_v4  ;;  %566 = vmatpush.bf16.msra.mxu3 %v528_v4 }
  0x20   : > { %328 = vmatpush.bf16.msra.mxu0 %v527_v5  ;;  %567 = vmatpush.bf16.msra.mxu1 %v527_v5 }
  0x21   : > { %568 = vmatpush.bf16.msra.mxu2 %v527_v5  ;;  %569 = vmatpush.bf16.msra.mxu3 %v527_v5 }
  0x24   : > { %329 = vmatpush.bf16.msra.mxu0 %v526_v6  ;;  %570 = vmatpush.bf16.msra.mxu1 %v526_v6 }
  0x25   : > { %571 = vmatpush.bf16.msra.mxu2 %v526_v6  ;;  %572 = vmatpush.bf16.msra.mxu3 %v526_v6 }
  0x28   : > { %330 = vmatpush.bf16.msra.mxu0 %v525_v7  ;;  %573 = vmatpush.bf16.msra.mxu1 %v525_v7 }
  0x29   : > { %574 = vmatpush.bf16.msra.mxu2 %v525_v7  ;;  %575 = vmatpush.bf16.msra.mxu3 %v525_v7 }
  0x2b   : > { %331 = vmatmul.bf16.vlgmr.msra.gmra.mxu0 %v521_v8  ;;  %336 = vmatmul.bf16.vlgmr.msra.gmra.mxu1 %v522_v9 }
  0x2c   : > { %341 = vmatmul.bf16.vlgmr.msra.gmra.mxu2 %v523_v10  ;;  %346 = vmatmul.bf16.vlgmr.msra.gmra.mxu3 %v524_v11 }
  0xa8   : > { %v332_v17 = vpop.f32.mrf.mxu0  ;;  %v337_v18 = vpop.f32.mrf.mxu1 }
  0xa9   : > { %v333_v19 = vadd.f32 %v584_v14, %v332_v17  ;;  %v338_v20 = vadd.f32 %v584_v14, %v337_v18 }
  0xab   : > { %v368_v21 = vadd.f32 %v535_v15, %v333_v19  ;;  %v370_v22 = vadd.f32 %v539_v16, %v338_v20 }
  0xad   : > { %v376_v25 = vmax.f32 %v368_v21, 0.0  ;;  %v378_v26 = vmax.f32 %v370_v22, 0.0 }
  0xaf   : > { %384 = vst [vmem:[%s666_s21] sm:$0xff] %v376_v25  ;;  %v342_v29 = vpop.f32.mrf.mxu2  ;;  %v347_v30 = vpop.f32.mrf.mxu3 }
  0xb0   : > { %386 = vst [vmem:[%s666_s21 + $0x10] sm:$0xff] %v378_v26  ;;  %v343_v33 = vadd.f32 %v584_v14, %v342_v29  ;;  %v348_v34 = vadd.f32 %v584_v14, %v347_v30  ;;  %v334_v35 = vpop.f32.mrf.mxu0  ;;  %v339_v36 = vpop.f32.mrf.mxu1 }
  0xb1   : > { %v335_v37 = vadd.f32 %v584_v14, %v334_v35  ;;  %v340_v38 = vadd.f32 %v584_v14, %v339_v36 }
  0xb2   : > { %v372_v39 = vadd.f32 %v543_v27, %v343_v33  ;;  %v374_v40 = vadd.f32 %v547_v28, %v348_v34 }
  0xb3   : > { %v369_v41 = vadd.f32 %v536_v31, %v335_v37  ;;  %v371_v42 = vadd.f32 %v540_v32, %v340_v38 }
  0xb4   : > { %v380_v43 = vmax.f32 %v372_v39, 0.0  ;;  %v382_v44 = vmax.f32 %v374_v40, 0.0 }
  0xb5   : > { %v377_v45 = vmax.f32 %v369_v41, 0.0  ;;  %v379_v46 = vmax.f32 %v371_v42, 0.0 }
  0xb6   : > { %388 = vst [vmem:[%s666_s21 + $0x20] sm:$0xff] %v380_v43 }
  0xb7   : > { %390 = vst [vmem:[%s666_s21 + $0x30] sm:$0xff] %v382_v44  ;;  %v344_v49 = vpop.f32.mrf.mxu2  ;;  %v349_v50 = vpop.f32.mrf.mxu3 }
  0xb8   : > { %385 = vst [vmem:[%s666_s21 + $0x8] sm:$0xff] %v377_v45  ;;  %v345_v51 = vadd.f32 %v584_v14, %v344_v49  ;;  %v350_v52 = vadd.f32 %v584_v14, %v349_v50 }
  0xb9   : > { %387 = vst [vmem:[%s666_s21 + $0x18] sm:$0xff] %v379_v46 }
  0xba   : > { %v373_v53 = vadd.f32 %v544_v47, %v345_v51  ;;  %v375_v54 = vadd.f32 %v548_v48, %v350_v52 }
  0xbc   : > { %v381_v55 = vmax.f32 %v373_v53, 0.0  ;;  %v383_v56 = vmax.f32 %v375_v54, 0.0 }
  0xbe   : > { %389 = vst [vmem:[%s666_s21 + $0x28] sm:$0xff] %v381_v55 }
  0xbf   : > { %391 = vst [vmem:[%s666_s21 + $0x38] sm:$0xff] %v383_v56 }
  0xc0 PF: > { %s14_s15 = sadd.s32 1, %s591_s15  }
  0xc1   : > { %p11_p4 = scmp.ge.s32.totalorder %s14_s15, 4  }
  0xc3   :  { %13 = sbr.rel (!%p11_p4) target bundleno = 1 (0x1), region = 69 }

</bundles_post_ra>
